<compile_context>
chip_gen: v7x
topology: tpu7x:2x2x1
jax: 0.10.0
libtpu: 0.0.40
codegen_flags: <defaults>
</compile_context>

<pallas_src>
import functools

import jax
import jax.numpy as jnp
from jax.experimental import pallas as pl
from jax.experimental.pallas import tpu as pltpu

LATENT_SIZE = 16
HIDDEN_SIZE = 128
OUTPUT_SIZE = 28 * 28   # 784


def _round_up(x, m):
    return (x + m - 1) // m * m


def decoder_kernel(x_ref, w1_ref, b1_ref, w2_ref, b2_ref, out_ref):
    # Hidden layer: relu(x @ W1 + b1), f32 accumulation on the MXU.
    h = jnp.dot(x_ref[...], w1_ref[...], preferred_element_type=jnp.float32)
    h = jnp.maximum(h + b1_ref[...], 0.0)
    # Output layer: sigmoid(h @ W2 + b2).  W2/b2 are lane-padded to 896 cols.
    logits = jnp.dot(h, w2_ref[...], preferred_element_type=jnp.float32)
    logits = logits + b2_ref[...]
    out_ref[...] = jax.nn.sigmoid(logits).astype(out_ref.dtype)


@functools.partial(jax.jit, static_argnames=("batch_tile",))
def decoder_forward(x, w1, b1, w2, b2, *, batch_tile=256):
    """x: (B, LATENT_SIZE) f32.  Weights pre-transposed to (in, out)."""
    B, L = x.shape
    H = w1.shape[1]
    O = w2.shape[1]

    # Lane-dense output: pad output feature dim to a multiple of 128.
    O_pad = _round_up(O, 128)
    if O_pad != O:
        w2 = jnp.pad(w2, ((0, 0), (0, O_pad - O)))
        b2 = jnp.pad(b2, ((0, 0), (0, O_pad - O)))

    # Batch tiling: clamp tile for small batches, pad batch to a tile multiple.
    tile = min(batch_tile, _round_up(B, 8))
    B_pad = _round_up(B, tile)
    if B_pad != B:
        x = jnp.pad(x, ((0, B_pad - B), (0, 0)))

    grid = (B_pad // tile,)

    weight_spec = lambda shape: pl.BlockSpec(shape, lambda i: (0, 0))

    # Advisory cost estimate so XLA schedules the surrounding pad/slice well.
    cost = pl.CostEstimate(
        flops=2 * B_pad * (L * H + H * O_pad),
        transcendentals=B_pad * O_pad,
        bytes_accessed=(B_pad * L * 4 + L * H * 4 + H * 4
                        + H * O_pad * 4 + O_pad * 4 + B_pad * O_pad * 4),
    )

    out = pl.pallas_call(
        decoder_kernel,
        out_shape=jax.ShapeDtypeStruct((B_pad, O_pad), jnp.float32),
        grid_spec=pltpu.PrefetchScalarGridSpec(
            num_scalar_prefetch=0,
            grid=grid,
            in_specs=[
                pl.BlockSpec((tile, L), lambda i: (i, 0)),   # x tile
                weight_spec((L, H)),                         # W1
                weight_spec((1, H)),                         # b1
                weight_spec((H, O_pad)),                     # W2 (padded)
                weight_spec((1, O_pad)),                     # b2 (padded)
            ],
            out_specs=pl.BlockSpec((tile, O_pad), lambda i: (i, 0)),
        ),
        compiler_params=pltpu.CompilerParams(
            dimension_semantics=("parallel",)),
        cost_estimate=cost,
    )(x, w1, b1, w2, b2)

    return out[:B, :O]


def init_linear(key, fan_in, fan_out):
    """Deterministic init mimicking torch.nn.Linear (uniform +/- 1/sqrt(fan_in)).
    Returns weight already transposed to (fan_in, fan_out) and bias (1, fan_out)."""
    kw, kb = jax.random.split(key)
    bound = 1.0 / jnp.sqrt(fan_in)
    w = jax.random.uniform(kw, (fan_in, fan_out), jnp.float32, -bound, bound)
    b = jax.random.uniform(kb, (1, fan_out), jnp.float32, -bound, bound)
    return w, b


def reference_forward(x, w1, b1, w2, b2):
    h = jax.nn.relu(x @ w1 + b1)
    return jax.nn.sigmoid(h @ w2 + b2)


if __name__ == "__main__":
    key = jax.random.PRNGKey(0)
    k_x, k_l1, k_l2 = jax.random.split(key, 3)

    B = 8  # small test batch; x shape follows the module: (B, latent_size)
    x = jax.random.normal(k_x, (B, LATENT_SIZE), jnp.float32)

    w1, b1 = init_linear(k_l1, LATENT_SIZE, HIDDEN_SIZE)
    w2, b2 = init_linear(k_l2, HIDDEN_SIZE, OUTPUT_SIZE)

    out = decoder_forward(x, w1, b1, w2, b2)
    jax.block_until_ready(out)

    # Correctness check against plain-JAX reference.
    out_ref = reference_forward(x, w1, b1, w2, b2)
    assert out.shape == (B, OUTPUT_SIZE)
    assert jnp.allclose(out, out_ref, atol=1e-5, rtol=1e-5)

    print("KERNEL_OK")
</pallas_src>

<mosaic_0001>
module attributes {stable_mosaic.version = 11 : i64} {
  func.func @decoder_kernel(%arg0: i32, %arg1: memref<8x16xf32, #tpu.memory_space<vmem>>, %arg2: memref<16x128xf32, #tpu.memory_space<vmem>>, %arg3: memref<1x128xf32, #tpu.memory_space<vmem>>, %arg4: memref<128x896xf32, #tpu.memory_space<vmem>>, %arg5: memref<1x896xf32, #tpu.memory_space<vmem>>, %arg6: memref<8x896xf32, #tpu.memory_space<vmem>>) attributes {dimension_semantics = [#tpu.dimension_semantics<parallel>], iteration_bounds = array<i64: 1>, scalar_prefetch = 0 : i64, scratch_operands = 0 : i64, tpu.core_type = #tpu.core_type<tc>, window_params = [{transform_indices = @transform_0, window_bounds = array<i64: 8, 16>}, {pipeline_mode = #tpu.pipeline_mode<synchronous>, transform_indices = @transform_1, window_bounds = array<i64: 16, 128>}, {pipeline_mode = #tpu.pipeline_mode<synchronous>, transform_indices = @transform_2, window_bounds = array<i64: 1, 128>}, {pipeline_mode = #tpu.pipeline_mode<synchronous>, transform_indices = @transform_3, window_bounds = array<i64: 128, 896>}, {pipeline_mode = #tpu.pipeline_mode<synchronous>, transform_indices = @transform_4, window_bounds = array<i64: 1, 896>}, {transform_indices = @transform_5, window_bounds = array<i64: 8, 896>}]} {
    %c0 = arith.constant 0 : index
    %c0_0 = arith.constant 0 : index
    %0 = vector.load %arg1[%c0, %c0_0] : memref<8x16xf32, #tpu.memory_space<vmem>>, vector<8x16xf32>
    %c0_1 = arith.constant 0 : index
    %c0_2 = arith.constant 0 : index
    %1 = vector.load %arg2[%c0_1, %c0_2] : memref<16x128xf32, #tpu.memory_space<vmem>>, vector<16x128xf32>
    %cst = arith.constant dense<0.000000e+00> : vector<8x128xf32>
    %2 = tpu.matmul %0, %1, %cst {dimension_numbers = #tpu.dot_dimension_numbers<[1], [0], [0], [1], [0, 0, 1, 1], [], []>} : vector<8x16xf32>, vector<16x128xf32>, vector<8x128xf32> -> vector<8x128xf32>
    %c0_3 = arith.constant 0 : index
    %c0_4 = arith.constant 0 : index
    %3 = vector.load %arg3[%c0_3, %c0_4] : memref<1x128xf32, #tpu.memory_space<vmem>>, vector<1x128xf32>
    %4 = vector.broadcast %3 : vector<1x128xf32> to vector<8x128xf32>
    %5 = arith.addf %2, %4 : vector<8x128xf32>
    %cst_5 = arith.constant 0.000000e+00 : f32
    %6 = vector.broadcast %cst_5 : f32 to vector<8x128xf32>
    %7 = arith.maximumf %5, %6 : vector<8x128xf32>
    %c0_6 = arith.constant 0 : index
    %c0_7 = arith.constant 0 : index
    %8 = vector.load %arg4[%c0_6, %c0_7] : memref<128x896xf32, #tpu.memory_space<vmem>>, vector<128x896xf32>
    %cst_8 = arith.constant dense<0.000000e+00> : vector<8x896xf32>
    %9 = tpu.matmul %7, %8, %cst_8 {dimension_numbers = #tpu.dot_dimension_numbers<[1], [0], [0], [1], [0, 0, 1, 1], [], []>} : vector<8x128xf32>, vector<128x896xf32>, vector<8x896xf32> -> vector<8x896xf32>
    %c0_9 = arith.constant 0 : index
    %c0_10 = arith.constant 0 : index
    %10 = vector.load %arg5[%c0_9, %c0_10] : memref<1x896xf32, #tpu.memory_space<vmem>>, vector<1x896xf32>
    %11 = vector.broadcast %10 : vector<1x896xf32> to vector<8x896xf32>
    %12 = arith.addf %9, %11 : vector<8x896xf32>
    %13 = arith.negf %12 : vector<8x896xf32>
    %14 = math.exp %13 : vector<8x896xf32>
    %cst_11 = arith.constant 1.000000e+00 : f32
    %15 = vector.broadcast %cst_11 : f32 to vector<8x896xf32>
    %16 = arith.addf %15, %14 : vector<8x896xf32>
    %17 = arith.divf %15, %16 : vector<8x896xf32>
    %c0_12 = arith.constant 0 : index
    %c0_13 = arith.constant 0 : index
    %18 = vector.load %arg6[%c0_12, %c0_13] : memref<8x896xf32, #tpu.memory_space<vmem>>, vector<8x896xf32>
    tpu.vector_store %arg6[%c0_12, %c0_13], %17 {strides = array<i32>} : memref<8x896xf32, #tpu.memory_space<vmem>>, vector<8x896xf32>,
    return
  }
  func.func @transform_0(%arg0: i32) -> (i32, i32) {
    %c0_i32 = arith.constant 0 : i32
    %c0_i32_0 = arith.constant 0 : i32
    return %arg0, %c0_i32 : i32, i32
  }
  func.func @transform_1(%arg0: i32) -> (i32, i32) {
    %c0_i32 = arith.constant 0 : i32
    %c0_i32_0 = arith.constant 0 : i32
    %c0_i32_1 = arith.constant 0 : i32
    return %c0_i32, %c0_i32_0 : i32, i32
  }
  func.func @transform_2(%arg0: i32) -> (i32, i32) {
    %c0_i32 = arith.constant 0 : i32
    %c0_i32_0 = arith.constant 0 : i32
    %c0_i32_1 = arith.constant 0 : i32
    return %c0_i32, %c0_i32_0 : i32, i32
  }
  func.func @transform_3(%arg0: i32) -> (i32, i32) {
    %c0_i32 = arith.constant 0 : i32
    %c0_i32_0 = arith.constant 0 : i32
    %c0_i32_1 = arith.constant 0 : i32
    return %c0_i32, %c0_i32_0 : i32, i32
  }
  func.func @transform_4(%arg0: i32) -> (i32, i32) {
    %c0_i32 = arith.constant 0 : i32
    %c0_i32_0 = arith.constant 0 : i32
    %c0_i32_1 = arith.constant 0 : i32
    return %c0_i32, %c0_i32_0 : i32, i32
  }
  func.func @transform_5(%arg0: i32) -> (i32, i32) {
    %c0_i32 = arith.constant 0 : i32
    %c0_i32_0 = arith.constant 0 : i32
    return %arg0, %c0_i32 : i32, i32
  }
}

</mosaic_0001>

<bundles_post_ra>
// kernel: decoder_forward.1
= control target key start
LH: loop header
LB: loop body
LE: loop exit
PB: predicated region body
PF: predicated region fallthrough
CT: control target
= control target key end

     0   :  { %v851_v2 = vmov 0.0|0.0   ;;  %vm852_vm0 = vmmov 0   ;;  %v853_v4 = vmov 0.0   ;;  %vm31_vm1 = vcmask 130048   ;;  %s1271_s0 = inlined_call_operand.vmem [shape: f32[8,16], index: 0, kind: input, shape index: {}]   ;;  %s1272_s1 = inlined_call_operand.vmem [shape: f32[16,128], index: 1, kind: input, shape index: {}]   ;;  %s1273_s2 = inlined_call_operand.vmem [shape: f32[1,128], index: 2, kind: input, shape index: {}]   ;;  %s1274_s3 = inlined_call_operand.vmem [shape: f32[128,896], index: 3, kind: input, shape index: {}]   ;;  %s1275_s4 = inlined_call_operand.vmem [shape: f32[1,896], index: 4, kind: input, shape index: {}]   ;;  %s1276_s5 = inlined_call_operand.hbm [shape: f32[8,896], index: 5, kind: output, shape index: {}]  }
   0x1   :  { %v22_v0 = vld [vmem:[%s1272_s1] sm:$0xff]  ;;  %v23_v1 = vld [vmem:[%s1272_s1 + $0x8] sm:$0xff]  ;;  %672 = vmatprep.subr.bf16.mxu0 %v851_v2  ;;  %634 = vmatprep.mubr.msk.f32.mxu0 %vm852_vm0, %v853_v4  ;;  %v109_v8 = vld [vmem:[%s1274_s3 + $0x18] sm:$0xff] }
   0x2   :  { %v673_v3 = vpack.c.bf16 %v23_v1, %v22_v0  ;;  %v21_v5 = vld [vmem:[%s1271_s0] sm:$0xff]  ;;  %v107_v6 = vld [vmem:[%s1274_s3 + $0x8] sm:$0xff]  ;;  %v116_v10 = vld [vmem:[%s1274_s3 + $0x50] sm:$0xff]  ;;  %319 = vmatprep.mubr.f32.mxu1 %v853_v4 }
   0x3   :  { %v114_v7 = vld [vmem:[%s1274_s3 + $0x40] sm:$0xff]  ;;  %v113_v12 = vld [vmem:[%s1274_s3 + $0x38] sm:$0xff]  ;;  %v707_v13 = vpack.c.bf16 %v116_v10, %v109_v8  ;;  %v108_v15 = vld [vmem:[%s1274_s3 + $0x10] sm:$0xff] }
   0x4   :  { %v675_v9 = vpack.c.bf16 %v114_v7, %v107_v6  ;;  %v106_v11 = vld [vmem:[%s1274_s3] sm:$0xff]  ;;  %674 = vmatpush3.bf16.msra.mxu0 %v673_v3  ;;  %v115_v16 = vld [vmem:[%s1274_s3 + $0x48] sm:$0xff]  ;;  %v121_v17 = vld [vmem:[%s1274_s3 + $0x78] sm:$0xff] }
   0x5   :  { %v677_v14 = vpack.c.bf16 %v113_v12, %v106_v11  ;;  %v709_v18 = vpack.c.bf16 %v115_v16, %v108_v15  ;;  %v128_v19 = vld [vmem:[%s1274_s3 + $0xb0] sm:$0xff]  ;;  %v123_v20 = vld [vmem:[%s1274_s3 + $0x88] sm:$0xff]  ;;  %v130_v21 = vld [vmem:[%s1274_s3 + $0xc0] sm:$0xff]  ;;  %708 = vmatprep.subr.bf16.mxu0 %v707_v13 }
   0x6   :  { %676 = vmatprep.subr.bf16.mxu1 %v675_v9  ;;  %v679_v22 = vpack.c.bf16 %v128_v19, %v121_v17  ;;  %v711_v23 = vpack.c.bf16 %v130_v21, %v123_v20  ;;  %v120_v24 = vld [vmem:[%s1274_s3 + $0x70] sm:$0xff]  ;;  %v127_v25 = vld [vmem:[%s1274_s3 + $0xa8] sm:$0xff]  ;;  %v122_v26 = vld [vmem:[%s1274_s3 + $0x80] sm:$0xff] }
   0x7   :  { %678 = vmatpush1.bf16.msra.mxu1 %v677_v14  ;;  %635 = vmatmul.mubr.msk.f32.vlgmr.msra.gmra.mrb[0].mxu0 %vm31_vm1, %v21_v5  ;;  %v681_v27 = vpack.c.bf16 %v127_v25, %v120_v24  ;;  %v129_v28 = vld [vmem:[%s1274_s3 + $0xb8] sm:$0xff]  ;;  %v135_v29 = vld [vmem:[%s1274_s3 + $0xe8] sm:$0xff]  ;;  %v142_v30 = vld [vmem:[%s1274_s3 + $0x120] sm:$0xff] }
   0x8   :  { %710 = vmatpush1.bf16.msra.mxu0 %v709_v18  ;;  %680 = vmatprep.subr.bf16.mxu1 %v679_v22  ;;  %v713_v31 = vpack.c.bf16 %v129_v28, %v122_v26  ;;  %v683_v32 = vpack.c.bf16 %v142_v30, %v135_v29  ;;  %v137_v33 = vld [vmem:[%s1274_s3 + $0xf8] sm:$0xff]  ;;  %v144_v34 = vld [vmem:[%s1274_s3 + $0x130] sm:$0xff]  ;;  %v134_v35 = vld [vmem:[%s1274_s3 + $0xe0] sm:$0xff] }
   0x9   :  { %712 = vmatprep.subr.bf16.mxu0 %v711_v23  ;;  %v715_v36 = vpack.c.bf16 %v144_v34, %v137_v33  ;;  %v141_v37 = vld [vmem:[%s1274_s3 + $0x118] sm:$0xff]  ;;  %v136_v38 = vld [vmem:[%s1274_s3 + $0xf0] sm:$0xff]  ;;  %v143_v39 = vld [vmem:[%s1274_s3 + $0x128] sm:$0xff]  ;;  %390 = vmatprep.mubr.f32.mxu0 %v853_v4 }
   0xa   :  { %v685_v40 = vpack.c.bf16 %v141_v37, %v134_v35  ;;  %v149_v41 = vld [vmem:[%s1274_s3 + $0x158] sm:$0xff]  ;;  %v156_v42 = vld [vmem:[%s1274_s3 + $0x190] sm:$0xff]  ;;  %v151_v43 = vld [vmem:[%s1274_s3 + $0x168] sm:$0xff]  ;;  %v717_v48 = vpack.c.bf16 %v143_v39, %v136_v38 }
   0xb   :  { %682 = vmatpush1.bf16.msra.mxu1 %v681_v27  ;;  %v687_v44 = vpack.c.bf16 %v156_v42, %v149_v41  ;;  %v158_v45 = vld [vmem:[%s1274_s3 + $0x1a0] sm:$0xff]  ;;  %v148_v46 = vld [vmem:[%s1274_s3 + $0x150] sm:$0xff]  ;;  %v155_v47 = vld [vmem:[%s1274_s3 + $0x188] sm:$0xff] }
   0xc   :  { %684 = vmatprep.subr.bf16.mxu1 %v683_v32  ;;  %714 = vmatpush1.bf16.msra.mxu0 %v713_v31  ;;  %v163_v49 = vld [vmem:[%s1274_s3 + $0x1c8] sm:$0xff]  ;;  %v719_v50 = vpack.c.bf16 %v158_v45, %v151_v43  ;;  %v150_v51 = vld [vmem:[%s1274_s3 + $0x160] sm:$0xff]  ;;  %v157_v52 = vld [vmem:[%s1274_s3 + $0x198] sm:$0xff]  ;;  %v689_v54 = vpack.c.bf16 %v155_v47, %v148_v46 }
   0xd   :  { %716 = vmatprep.subr.bf16.mxu0 %v715_v36  ;;  %v170_v53 = vld [vmem:[%s1274_s3 + $0x200] sm:$0xff]  ;;  %v165_v55 = vld [vmem:[%s1274_s3 + $0x1d8] sm:$0xff]  ;;  %v172_v56 = vld [vmem:[%s1274_s3 + $0x210] sm:$0xff]  ;;  %v721_v60 = vpack.c.bf16 %v157_v52, %v150_v51 }
   0xe   :  { %v691_v57 = vpack.c.bf16 %v170_v53, %v163_v49  ;;  %v162_v58 = vld [vmem:[%s1274_s3 + $0x1c0] sm:$0xff]  ;;  %v169_v59 = vld [vmem:[%s1274_s3 + $0x1f8] sm:$0xff]  ;;  %v184_v62 = vld [vmem:[%s1274_s3 + $0x270] sm:$0xff]  ;;  %v723_v63 = vpack.c.bf16 %v172_v56, %v165_v55 }
   0xf   :  { %686 = vmatpush1.bf16.msra.mxu1 %v685_v40  ;;  %v177_v61 = vld [vmem:[%s1274_s3 + $0x238] sm:$0xff]  ;;  %v164_v0 = vld [vmem:[%s1274_s3 + $0x1d0] sm:$0xff]  ;;  %v171_v1 = vld [vmem:[%s1274_s3 + $0x208] sm:$0xff]  ;;  %v693_v3 = vpack.c.bf16 %v169_v59, %v162_v58 }
  0x10   :  { %688 = vmatprep.subr.bf16.mxu1 %v687_v44  ;;  %718 = vmatpush1.bf16.msra.mxu0 %v717_v48  ;;  %v179_v5 = vld [vmem:[%s1274_s3 + $0x248] sm:$0xff]  ;;  %v186_v6 = vld [vmem:[%s1274_s3 + $0x280] sm:$0xff]  ;;  %v695_v7 = vpack.c.bf16 %v184_v62, %v177_v61  ;;  %v176_v8 = vld [vmem:[%s1274_s3 + $0x230] sm:$0xff]  ;;  %v725_v10 = vpack.c.bf16 %v171_v1, %v164_v0 }
  0x11   :  { %720 = vmatprep.subr.bf16.mxu0 %v719_v50  ;;  %v183_v9 = vld [vmem:[%s1274_s3 + $0x268] sm:$0xff]  ;;  %v198_v12 = vld [vmem:[%s1274_s3 + $0x2e0] sm:$0xff]  ;;  %v727_v13 = vpack.c.bf16 %v186_v6, %v179_v5  ;;  %v185_v15 = vld [vmem:[%s1274_s3 + $0x278] sm:$0xff] }
  0x12   :  { %v191_v11 = vld [vmem:[%s1274_s3 + $0x2a8] sm:$0xff]  ;;  %v178_v14 = vld [vmem:[%s1274_s3 + $0x240] sm:$0xff] }
  0x13   :  { %690 = vmatpush1.bf16.msra.mxu1 %v689_v54 }
  0x14   :  { %692 = vmatprep.subr.bf16.mxu1 %v691_v57  ;;  %722 = vmatpush1.bf16.msra.mxu0 %v721_v60 }
  0x15   :  { %724 = vmatprep.subr.bf16.mxu0 %v723_v63 }
  0x16   :  { %10 = vsyncpa [#allocation3], 0  ;;  %v697_v16 = vpack.c.bf16 %v183_v9, %v176_v8  ;;  %v193_v17 = vld [vmem:[%s1274_s3 + $0x2b8] sm:$0xff]  ;;  %v200_v18 = vld [vmem:[%s1274_s3 + $0x2f0] sm:$0xff]  ;;  %v699_v19 = vpack.c.bf16 %v198_v12, %v191_v11  ;;  %v729_v22 = vpack.c.bf16 %v185_v15, %v178_v14 }
  0x17   :  { %694 = vmatpush1.bf16.msra.mxu1 %v693_v3  ;;  %v190_v20 = vld [vmem:[%s1274_s3 + $0x2a0] sm:$0xff]  ;;  %v197_v21 = vld [vmem:[%s1274_s3 + $0x2d8] sm:$0xff]  ;;  %v731_v23 = vpack.c.bf16 %v200_v18, %v193_v17  ;;  %v192_v24 = vld [vmem:[%s1274_s3 + $0x2b0] sm:$0xff] }
  0x18   :  { %696 = vmatprep.subr.bf16.mxu1 %v695_v7  ;;  %726 = vmatpush1.bf16.msra.mxu0 %v725_v10  ;;  %v199_v25 = vld [vmem:[%s1274_s3 + $0x2e8] sm:$0xff]  ;;  %v701_v26 = vpack.c.bf16 %v197_v21, %v190_v20  ;;  %v205_v28 = vld [vmem:[%s1274_s3 + $0x318] sm:$0xff]  ;;  %v212_v29 = vld [vmem:[%s1274_s3 + $0x350] sm:$0xff] }
  0x19   :  { %728 = vmatprep.subr.bf16.mxu0 %v727_v13  ;;  %v733_v27 = vpack.c.bf16 %v199_v25, %v192_v24  ;;  %v207_v30 = vld [vmem:[%s1274_s3 + $0x328] sm:$0xff]  ;;  %v703_v31 = vpack.c.bf16 %v212_v29, %v205_v28  ;;  %v214_v32 = vld [vmem:[%s1274_s3 + $0x360] sm:$0xff]  ;;  %v204_v33 = vld [vmem:[%s1274_s3 + $0x310] sm:$0xff] }
  0x1a   :  { %v211_v34 = vld [vmem:[%s1274_s3 + $0x348] sm:$0xff]  ;;  %v735_v35 = vpack.c.bf16 %v214_v32, %v207_v30  ;;  %v206_v37 = vld [vmem:[%s1274_s3 + $0x320] sm:$0xff]  ;;  %v213_v38 = vld [vmem:[%s1274_s3 + $0x358] sm:$0xff] }
  0x1b   :  { %698 = vmatpush1.bf16.msra.mxu1 %v697_v16  ;;  %v705_v36 = vpack.c.bf16 %v211_v34, %v204_v33  ;;  %v737_v39 = vpack.c.bf16 %v213_v38, %v206_v37  ;;  %v111_v40 = vld [vmem:[%s1274_s3 + $0x28] sm:$0xff]  ;;  %v118_v41 = vld [vmem:[%s1274_s3 + $0x60] sm:$0xff]  ;;  %v117_v45 = vld [vmem:[%s1274_s3 + $0x58] sm:$0xff] }
  0x1c   :  { %700 = vmatprep.subr.bf16.mxu1 %v699_v19  ;;  %730 = vmatpush1.bf16.msra.mxu0 %v729_v22  ;;  %v739_v42 = vpack.c.bf16 %v118_v41, %v111_v40  ;;  %v601_v43 = vld [vmem:[%s1273_s2] ss:$0 sm:$0xff]  ;;  %v112_v46 = vld [vmem:[%s1274_s3 + $0x30] sm:$0xff]  ;;  %v119_v47 = vld [vmem:[%s1274_s3 + $0x68] sm:$0xff] }
  0x1d   :  { %732 = vmatprep.subr.bf16.mxu0 %v731_v23  ;;  %v110_v44 = vld [vmem:[%s1274_s3 + $0x20] sm:$0xff]  ;;  %v125_v49 = vld [vmem:[%s1274_s3 + $0x98] sm:$0xff]  ;;  %v132_v50 = vld [vmem:[%s1274_s3 + $0xd0] sm:$0xff]  ;;  %v772_v54 = vpack.c.bf16 %v119_v47, %v112_v46 }
  0x1e   :  { %v741_v53 = vpack.c.bf16 %v117_v45, %v110_v44  ;;  %v124_v55 = vld [vmem:[%s1274_s3 + $0x90] sm:$0xff]  ;;  %v743_v57 = vpack.c.bf16 %v132_v50, %v125_v49  ;;  %v131_v58 = vld [vmem:[%s1274_s3 + $0xc8] sm:$0xff]  ;;  %v126_v59 = vld [vmem:[%s1274_s3 + $0xa0] sm:$0xff] }
  0x1f   :  { %702 = vmatpush1.bf16.msra.mxu1 %v701_v26  ;;  %v133_v60 = vld [vmem:[%s1274_s3 + $0xd8] sm:$0xff]  ;;  %v139_v61 = vld [vmem:[%s1274_s3 + $0x108] sm:$0xff]  ;;  %v146_v62 = vld [vmem:[%s1274_s3 + $0x140] sm:$0xff]  ;;  %v745_v63 = vpack.c.bf16 %v131_v58, %v124_v55 }
  0x20   :  { %734 = vmatpush1.bf16.msra.mxu0 %v733_v27  ;;  %704 = vmatprep.subr.bf16.mxu1 %v703_v31  ;;  %v775_v0 = vpack.c.bf16 %v133_v60, %v126_v59  ;;  %v138_v1 = vld [vmem:[%s1274_s3 + $0x100] sm:$0xff]  ;;  %v747_v3 = vpack.c.bf16 %v146_v62, %v139_v61  ;;  %v145_v5 = vld [vmem:[%s1274_s3 + $0x138] sm:$0xff]  ;;  %v140_v6 = vld [vmem:[%s1274_s3 + $0x110] sm:$0xff] }
  0x21   :  { %736 = vmatprep.subr.bf16.mxu0 %v735_v35  ;;  %v147_v7 = vld [vmem:[%s1274_s3 + $0x148] sm:$0xff]  ;;  %v153_v8 = vld [vmem:[%s1274_s3 + $0x178] sm:$0xff]  ;;  %v160_v9 = vld [vmem:[%s1274_s3 + $0x1b0] sm:$0xff]  ;;  %v749_v10 = vpack.c.bf16 %v145_v5, %v138_v1 }
  0x22   :  { %v778_v11 = vpack.c.bf16 %v147_v7, %v140_v6  ;;  %v152_v12 = vld [vmem:[%s1274_s3 + $0x170] sm:$0xff]  ;;  %v751_v13 = vpack.c.bf16 %v160_v9, %v153_v8  ;;  %v159_v14 = vld [vmem:[%s1274_s3 + $0x1a8] sm:$0xff]  ;;  %v161_v15 = vld [vmem:[%s1274_s3 + $0x1b8] sm:$0xff] }
  0x23   :  { %706 = vmatpush1.bf16.msra.mxu1 %v705_v36  ;;  %v167_v16 = vld [vmem:[%s1274_s3 + $0x1e8] sm:$0xff]  ;;  %v174_v17 = vld [vmem:[%s1274_s3 + $0x220] sm:$0xff]  ;;  %v753_v18 = vpack.c.bf16 %v159_v14, %v152_v12  ;;  %v173_v22 = vld [vmem:[%s1274_s3 + $0x218] sm:$0xff] }
  0x24   :  { %738 = vmatpush1.bf16.msra.mxu0 %v737_v39  ;;  %740 = vmatprep.subr.bf16.mxu1 %v739_v42  ;;  %v166_v20 = vld [vmem:[%s1274_s3 + $0x1e0] sm:$0xff]  ;;  %v755_v21 = vpack.c.bf16 %v174_v17, %v167_v16  ;;  %v168_v23 = vld [vmem:[%s1274_s3 + $0x1f0] sm:$0xff]  ;;  %v175_v24 = vld [vmem:[%s1274_s3 + $0x228] sm:$0xff] }
  0x25   :  { %771 = vmatprep.subr.bf16.mxu0 %v851_v2  ;;  %v181_v25 = vld [vmem:[%s1274_s3 + $0x258] sm:$0xff]  ;;  %v188_v26 = vld [vmem:[%s1274_s3 + $0x290] sm:$0xff]  ;;  %v757_v27 = vpack.c.bf16 %v173_v22, %v166_v20  ;;  %v784_v28 = vpack.c.bf16 %v175_v24, %v168_v23  ;;  %v187_v31 = vld [vmem:[%s1274_s3 + $0x288] sm:$0xff] }
  0x26   :  { %v180_v29 = vld [vmem:[%s1274_s3 + $0x250] sm:$0xff]  ;;  %v759_v30 = vpack.c.bf16 %v188_v26, %v181_v25  ;;  %v182_v32 = vld [vmem:[%s1274_s3 + $0x260] sm:$0xff]  ;;  %v189_v33 = vld [vmem:[%s1274_s3 + $0x298] sm:$0xff] }
  0x27   :  { %v195_v34 = vld [vmem:[%s1274_s3 + $0x2c8] sm:$0xff]  ;;  %v202_v35 = vld [vmem:[%s1274_s3 + $0x300] sm:$0xff]  ;;  %v761_v36 = vpack.c.bf16 %v187_v31, %v180_v29  ;;  %v787_v37 = vpack.c.bf16 %v189_v33, %v182_v32  ;;  %v201_v40 = vld [vmem:[%s1274_s3 + $0x2f8] sm:$0xff] }
  0x28   :  { %v194_v38 = vld [vmem:[%s1274_s3 + $0x2c0] sm:$0xff]  ;;  %v763_v39 = vpack.c.bf16 %v202_v35, %v195_v34  ;;  %v196_v41 = vld [vmem:[%s1274_s3 + $0x2d0] sm:$0xff]  ;;  %v203_v42 = vld [vmem:[%s1274_s3 + $0x308] sm:$0xff] }
  0x29   :  { %v216_v44 = vld [vmem:[%s1274_s3 + $0x370] sm:$0xff]  ;;  %v765_v45 = vpack.c.bf16 %v201_v40, %v194_v38  ;;  %v790_v46 = vpack.c.bf16 %v203_v42, %v196_v41  ;;  %v215_v49 = vld [vmem:[%s1274_s3 + $0x368] sm:$0xff]  ;;  %v210_v50 = vld [vmem:[%s1274_s3 + $0x340] sm:$0xff] }
  0x2a   :  { %v208_v47 = vld [vmem:[%s1274_s3 + $0x330] sm:$0xff]  ;;  %v218_v59 = vld [vmem:[%s1275_s4] sm:$0xff] }
  0xda   :  { %v101_v48 = vpop.f32.mrb[0].mxu0 }
  0xdb   :  { %v102_v51 = vadd.f32 %v601_v43, %v101_v48  ;;  %v636_v52 = vpop.f32.mrb[1].mxu0  ;;  %v209_v43 = vld [vmem:[%s1274_s3 + $0x338] sm:$0xff] }
  0xdc   :  { %v767_v48 = vpack.c.bf16 %v216_v44, %v209_v43  ;;  %v769_v52 = vpack.c.bf16 %v215_v49, %v208_v47 }
  0xdd   :  { %v1123_v56 = vmax.f32 %v102_v51, 0.0  ;;  %v217_v51 = vld [vmem:[%s1274_s3 + $0x378] sm:$0xff] }
  0xdf   :  { %320 = vmatmul.mubr.f32.vlgmr.msra.gmra.mrb[0].mxu1 %v1123_v56  ;;  %391 = vmatmul.mubr.f32.vlgmr.msra.gmra.mrb[2].mxu0 %v1123_v56 }
  0xe0   :  { %742 = vmatpush1.bf16.msra.mxu1 %v741_v53  ;;  %773 = vmatpush3.bf16.msra.mxu0 %v772_v54  ;;  %v793_v53 = vpack.c.bf16 %v217_v51, %v210_v50  ;;  %v220_v54 = vlaneseq }
  0xe1   :  { %744 = vmatprep.subr.bf16.mxu1 %v743_v57  ;;  %774 = vmatprep.subr.bf16.mxu0 %v851_v2 }
  0xe2   :  { %461 = vmatprep.mubr.f32.mxu1 %v853_v4  ;;  %669 = vmatprep.mubr.msk.f32.mxu0 %vm852_vm0, %v853_v4  ;;  %v154_v4 = vld [vmem:[%s1274_s3 + $0x180] sm:$0xff]  ;;  %v221_v55 = vshrl.u32 %v220_v54, 7  ;;  %s854_s3 = smov [#allocation2]  }
  0xe3   :  { %v781_v19 = vpack.c.bf16 %v161_v15, %v154_v4  ;;  %s593_s4 = sshll.u32 %s854_s3, 4  ;;  %s594_s4 = int_to_ptr.vmem [resolvable:$true] %s593_s4 }
  0xe4   :  { %746 = vmatpush1.bf16.msra.mxu1 %v745_v63  ;;  %776 = vmatpush3.bf16.msra.mxu0 %v775_v0  ;;  %v222_v57 = vsub.s32 0, %v221_v55  ;;  %v230_v58 = vsub.s32 2, %v221_v55  ;;  %v226_v60 = vsub.s32 1, %v221_v55  ;;  %v234_v61 = vsub.s32 3, %v221_v55  ;;  %s827_s2 = scalar_lea.vmem %s594_s4, 896  ;;  %p832_p1 = scmp.lt.s32.totalorder %s594_s4, %s594_s4 }
  0xe5   :  { %748 = vmatprep.subr.bf16.mxu1 %v747_v3  ;;  %777 = vmatprep.subr.bf16.mxu0 %v851_v2  ;;  %v246_v22 = vsub.s32 6, %v221_v55  ;;  %v242_v23 = vsub.s32 5, %v221_v55  ;;  %p828_p0 = scmp.ne.s32.totalorder %s594_s4, %s827_s2  ;;  %p833_p2 = scmp.lt.s32.totalorder %s827_s2, %s827_s2 }
  0xe6   :  { %v223_v62 = vrot.slane %v218_v59, %v222_v57  ;;  %v231_v63 = vrot.slane %v218_v59, %v230_v58  ;;  %v227_v0 = vrot.slane %v218_v59, %v226_v60 }
  0xe7   :  { %v243_v29 = vrot.slane %v218_v59, %v242_v23  ;;  %p834_p3 = por %p833_p2, %p832_p1 }
  0xe8   :  { %750 = vmatpush1.bf16.msra.mxu1 %v749_v10  ;;  %779 = vmatpush3.bf16.msra.mxu0 %v778_v11 }
  0xe9   :  { %752 = vmatprep.subr.bf16.mxu1 %v751_v13  ;;  %780 = vmatprep.subr.bf16.mxu0 %v851_v2  ;;  %p835_p4 = pnand %p834_p3, %p828_p0 }
  0xec   :  { %754 = vmatpush1.bf16.msra.mxu1 %v753_v18  ;;  %782 = vmatpush3.bf16.msra.mxu0 %v781_v19 }
  0xed   :  { %756 = vmatprep.subr.bf16.mxu1 %v755_v21  ;;  %783 = vmatprep.subr.bf16.mxu0 %v851_v2  ;;  %v238_v21 = vsub.s32 4, %v221_v55 }
  0xef   :  { %v239_v26 = vrot.slane %v218_v59, %v238_v21 }
  0xf0   :  { %758 = vmatpush1.bf16.msra.mxu1 %v757_v27  ;;  %785 = vmatpush3.bf16.msra.mxu0 %v784_v28  ;;  %v247_v27 = vrot.slane %v218_v59, %v246_v22 }
  0xf1   :  { %760 = vmatprep.subr.bf16.mxu1 %v759_v30  ;;  %786 = vmatprep.subr.bf16.mxu0 %v851_v2 }
  0xf4   :  { %762 = vmatpush1.bf16.msra.mxu1 %v761_v36  ;;  %788 = vmatpush3.bf16.msra.mxu0 %v787_v37 }
  0xf5   :  { %764 = vmatprep.subr.bf16.mxu1 %v763_v39  ;;  %789 = vmatprep.subr.bf16.mxu0 %v851_v2 }
  0xf8   :  { %766 = vmatpush1.bf16.msra.mxu1 %v765_v45  ;;  %791 = vmatpush3.bf16.msra.mxu0 %v790_v46 }
  0xf9   :  { %768 = vmatprep.subr.bf16.mxu1 %v767_v48  ;;  %792 = vmatprep.subr.bf16.mxu0 %v851_v2  ;;  %v235_v2 = vrot.slane %v218_v59, %v234_v61 }
  0xfc   :  { %770 = vmatpush1.bf16.msra.mxu1 %v769_v52  ;;  %794 = vmatpush3.bf16.msra.mxu0 %v793_v53 }
  0xff   :  { %462 = vmatmul.mubr.f32.vlgmr.msra.gmra.mrb[2].mxu1 %v1123_v56  ;;  %670 = vmatmul.mubr.f32.vlgmr.msra.gmra.mrb[4].mxu0 %v1123_v56 }
 0x1b2   :  { %v321_v1 = vpop.f32.mrb[0].mxu1  ;;  %v392_v3 = vpop.f32.mrb[2].mxu0 }
 0x1b3   :  { %v322_v5 = vadd.f32 %v321_v1, %v223_v62  ;;  %v393_v6 = vadd.f32 %v392_v3, %v231_v63  ;;  %v323_v7 = vpop.f32.mrb[1].mxu1  ;;  %v394_v56 = vpop.f32.mrb[3].mxu0 }
 0x1b4   :  { %v324_v8 = vadd.f32 %v323_v7, %v227_v0  ;;  %v395_v9 = vadd.f32 %v394_v56, %v235_v2 }
 0x1b5   :  { %v603_v10 = vmul.f32 -1.442695, %v322_v5  ;;  %v605_v11 = vmul.f32 -1.442695, %v393_v6 }
 0x1b6   :  { %v604_v12 = vmul.f32 -1.442695, %v324_v8  ;;  %v606_v13 = vmul.f32 -1.442695, %v395_v9 }
 0x1b7   :  { %799 = vpow2.f32 %v603_v10 }
 0x1b8   :  { %801 = vpow2.f32 %v605_v11 }
 0x1b9   :  { %803 = vpow2.f32 %v604_v12 }
 0x1ba   :  { %805 = vpow2.f32 %v606_v13 }
 0x1c1   :  { %v800_v14 = vpop.eup %799 }
 0x1c2   :  { %v802_v4 = vpop.eup %801  ;;  %v559_v15 = vadd.f32 1.0, %v800_v14 }
 0x1c3   :  { %v804_v16 = vpop.eup %803  ;;  %v561_v17 = vadd.f32 1.0, %v802_v4 }
 0x1c4   :  { %v806_v18 = vpop.eup %805  ;;  %807 = vrcp.f32 %v559_v15  ;;  %v560_v19 = vadd.f32 1.0, %v804_v16 }
 0x1c5   :  { %809 = vrcp.f32 %v561_v17  ;;  %v562_v20 = vadd.f32 1.0, %v806_v18 }
 0x1c6   :  { %811 = vrcp.f32 %v560_v19 }
 0x1c7   :  { %813 = vrcp.f32 %v562_v20 }
 0x1ce   :  { %v808_v24 = vpop.eup %807 }
 0x1cf   :  { %v810_v25 = vpop.eup %809  ;;  %580 = vst [vmem:[#allocation2] sm:$0xff] %v808_v24 }
 0x1d0   :  { %v812_v28 = vpop.eup %811  ;;  %582 = vst [vmem:[#allocation2 + $0x10] sm:$0xff] %v810_v25 }
 0x1d1   :  { %v814_v30 = vpop.eup %813  ;;  %581 = vst [vmem:[#allocation2 + $0x8] sm:$0xff] %v812_v28 }
 0x1d2   :  { %583 = vst [vmem:[#allocation2 + $0x18] sm:$0xff] %v814_v30  ;;  %v463_v31 = vpop.f32.mrb[2].mxu1  ;;  %v534_v32 = vpop.f32.mrb[4].mxu0 }
 0x1d3   :  { %v464_v33 = vadd.f32 %v463_v31, %v239_v26  ;;  %v535_v34 = vadd.f32 %v534_v32, %v247_v27  ;;  %v465_v35 = vpop.f32.mrb[3].mxu1  ;;  %v671_v36 = vpop.f32.mrb[5].mxu0 }
 0x1d4   :  { %v466_v37 = vadd.f32 %v465_v35, %v243_v29 }
 0x1d5   :  { %v607_v38 = vmul.f32 -1.442695, %v464_v33  ;;  %v609_v39 = vmul.f32 -1.442695, %v535_v34 }
 0x1d6   :  { %v608_v40 = vmul.f32 -1.442695, %v466_v37 }
 0x1d7   :  { %815 = vpow2.f32 %v607_v38 }
 0x1d8   :  { %817 = vpow2.f32 %v609_v39 }
 0x1d9   :  { %819 = vpow2.f32 %v608_v40 }
 0x1e1   :  { %v816_v41 = vpop.eup %815 }
 0x1e2   :  { %v818_v42 = vpop.eup %817  ;;  %v563_v43 = vadd.f32 1.0, %v816_v41 }
 0x1e3   :  { %v820_v44 = vpop.eup %819  ;;  %v565_v45 = vadd.f32 1.0, %v818_v42 }
 0x1e4   :  { %821 = vrcp.f32 %v563_v43  ;;  %v564_v46 = vadd.f32 1.0, %v820_v44 }
 0x1e5   :  { %823 = vrcp.f32 %v565_v45 }
 0x1e6   :  { %825 = vrcp.f32 %v564_v46 }
 0x1ee   :  { %v822_v47 = vpop.eup %821 }
 0x1ef   :  { %v824_v48 = vpop.eup %823  ;;  %584 = vst [vmem:[#allocation2 + $0x20] sm:$0xff] %v822_v47 }
 0x1f0   :  { %v826_v49 = vpop.eup %825  ;;  %586 = vst [vmem:[#allocation2 + $0x30] sm:$0xff] %v824_v48 }
 0x1f1   :  { %585 = vst [vmem:[#allocation2 + $0x28] sm:$0xff] %v826_v49 }
 0x1f2   :  { %838 = shalt.err (!%p835_p4)
}
 0x1f3   :  { %s839_s8 = scalar_lea.hbm %s1276_s5, 896 }
 0x1f4   :  { %p840_p5 = scmp.ne.s32.totalorder %s1276_s5, %s839_s8  ;;  %p843_p6 = scmp.lt.u32.totalorder %s839_s8, %s1276_s5 }
 0x1f6   :  { %p845_p7 = pnand %p843_p6, %p840_p5 }
 0x1f8   :  { %848 = shalt.err (!%p845_p7)
}
 0x1f9   :  { %596 = dma.vmem_to_hbm [thread:$0]  %s594_s4, 896, %s1276_s5, [#allocation3]  }
 0x1fa   :  { %849 = dma.done.wait [#allocation3], 896  }
 0x1fb   :  { %850 = vsyncadd [#allocation3], 4294966400 }
 0x1fc   :  { %600 = vsyncpa [#allocation3], 1 }

</bundles_post_ra>
